<compile_context>
chip_gen: v7x
topology: tpu7x:2x2x1
jax: 0.10.0
libtpu: 0.0.40
codegen_flags: <defaults>
</compile_context>

<pallas_src>
import jax
import jax.numpy as jnp
from jax.experimental import pallas as pl
from jax.experimental.pallas import tpu as pltpu

_LANE = 128


def _round_up(n, m):
    return ((n + m - 1) // m) * m


def _detect_buffered_support():
    # Probe once whether BlockSpec(pipeline_mode=pl.Buffered(k)) exists in this
    # jax version (construction only; lowering failures are handled separately).
    try:
        pl.BlockSpec((8, 128), lambda i: (0, 0), pipeline_mode=pl.Buffered(1))
        return True
    except (TypeError, AttributeError):
        return False


_HAS_BUFFERED = _detect_buffered_support()


def _tpu_params():
    """Chip-aware config: (physical VMEM bytes, TensorCores per chip).

    Pure configuration query; failures fall back to conservative defaults
    (64 MiB, 1 TC) that are safe on every generation.  This broad except never
    masks kernel build/lowering errors.
    """
    vmem_cap = 64 << 20
    num_tc = 1
    try:
        info = pltpu.get_tpu_info()
    except Exception:  # config query only
        return vmem_cap, num_tc
    vmem_cap = int(getattr(info, "vmem_capacity_bytes", vmem_cap) or vmem_cap)
    for attr in ("num_tensorcores", "tensor_cores_per_chip", "num_cores_per_chip",
                 "num_cores", "core_count"):
        v = getattr(info, attr, None)
        if isinstance(v, int) and v > 0:
            num_tc = v
            break
    return vmem_cap, num_tc


# --------------------------------------------------------------------------
# VMEM working-set estimates (bytes) for the two kernel variants.
# --------------------------------------------------------------------------
def _vmem_flat(bt, d_in_p, hidden_p, d_out_p, weight_bufs, itemsize):
    x = 2 * bt * d_in_p * itemsize                        # streamed x tile (2x buffered)
    out = 2 * bt * d_out_p * 4                            # output tile (2x buffered, f32 worst case)
    w = weight_bufs * (d_in_p * hidden_p + hidden_p * d_out_p) * itemsize
    b = weight_bufs * (hidden_p + d_out_p) * 4
    h = bt * hidden_p * 4                                 # f32 intermediate activations
    return x + out + w + b + h


def _vmem_ktiled(bt, k_tile, hidden_p, d_out_p, weight_bufs, itemsize):
    x = 2 * bt * k_tile * itemsize                        # streamed x (batch, K) tile
    w1 = 2 * k_tile * hidden_p * itemsize                 # W1 streamed along K (2x buffered)
    w2 = weight_bufs * hidden_p * d_out_p * itemsize      # W2 resident
    b = weight_bufs * (hidden_p + d_out_p) * 4
    acc = bt * hidden_p * 4                               # f32 accumulator scratch
    out = 2 * bt * d_out_p * 4
    return x + w1 + w2 + b + acc + out


def _half_tile(bt, row_align):
    bt = (bt // 2 // row_align) * row_align
    return max(bt, row_align)


def _choose_k_tile(d_in_p):
    for cand in (1024, 512, 256, 128):
        if d_in_p % cand == 0:
            return cand
    return d_in_p  # d_in_p is a multiple of 128, so practically unreachable


def _choose_tiles(B, d_in_p, hidden_p, d_out_p, itemsize, budget, num_tc,
                  row_align, weight_bufs, force_k_tiling, bt_override=None):
    """Returns (batch_tile, k_tile_or_None).  k_tile=None => fully-resident weights."""
    if bt_override is not None:
        bt = max(row_align, _round_up(bt_override, row_align))
        if (not force_k_tiling and
                _vmem_flat(bt, d_in_p, hidden_p, d_out_p, weight_bufs, itemsize) <= budget):
            return bt, None
        return bt, _choose_k_tile(d_in_p)

    # Largest tile first (tile 512 hits ~85% of HBM roofline vs 29% at 128).
    bt = max(row_align, min(512, _round_up(B, row_align)))

    # Megacore: only multi-TC chips (v7x) need >= one grid step per TensorCore.
    # Single-TC v5e/v6e keep the biggest tile (grid steps are a serial loop there).
    if num_tc > 1:
        while bt > 128 and pl.cdiv(B, bt) < num_tc:
            bt = _half_tile(bt, row_align)

    if not force_k_tiling:
        b = bt
        while True:
            if _vmem_flat(b, d_in_p, hidden_p, d_out_p, weight_bufs, itemsize) <= budget:
                return b, None
            if b <= 128:
                break  # don't shrink M further just to keep weights resident
            b = _half_tile(b, row_align)

    # K-tiled path: stream W1 along D_IN; W2 / biases stay resident.
    k_tile = _choose_k_tile(d_in_p)
    while _vmem_ktiled(bt, k_tile, hidden_p, d_out_p, weight_bufs, itemsize) > budget:
        if k_tile > 128:
            k_tile //= 2
        elif bt > row_align:
            bt = _half_tile(bt, row_align)
        else:
            break
    return bt, k_tile


# --------------------------------------------------------------------------
# Kernels
# --------------------------------------------------------------------------
def _mlp_kernel(x_ref, w1_ref, b1_ref, w2_ref, b2_ref, o_ref):
    # Linear 1 (MXU, f32 accumulation) + bias + ReLU (VPU, f32)
    h = jnp.dot(x_ref[...], w1_ref[...], preferred_element_type=jnp.float32)
    h = jnp.maximum(h + b1_ref[...], 0.0)                 # b1 is (1, HIDDEN_P), broadcasts
    # Linear 2
    y = jnp.dot(h.astype(w2_ref.dtype), w2_ref[...], preferred_element_type=jnp.float32)
    o_ref[...] = (y + b2_ref[...]).astype(o_ref.dtype)


def _mlp_kernel_ktiled(x_ref, w1_ref, b1_ref, w2_ref, b2_ref, o_ref, acc_ref):
    k = pl.program_id(1)

    @pl.when(k == 0)
    def _():
        acc_ref[...] = jnp.zeros_like(acc_ref)

    acc_ref[...] += jnp.dot(x_ref[...], w1_ref[...], preferred_element_type=jnp.float32)

    @pl.when(k == pl.num_programs(1) - 1)
    def _():
        h = jnp.maximum(acc_ref[...] + b1_ref[...], 0.0)
        y = jnp.dot(h.astype(w2_ref.dtype), w2_ref[...],
                    preferred_element_type=jnp.float32)
        o_ref[...] = (y + b2_ref[...]).astype(o_ref.dtype)


# --------------------------------------------------------------------------
# Wrapper
# --------------------------------------------------------------------------
def _pad2d(a, rows, cols, dtype):
    a = jnp.asarray(a, dtype)
    if a.shape == (rows, cols):
        return a                      # already lane-dense: no pad, no copy
    return jnp.zeros((rows, cols), dtype).at[: a.shape[0], : a.shape[1]].set(a)


def encoder_with_extra_layer(x, w1, b1, w2, b2, *, batch_tile=None,
                             compute_dtype=jnp.bfloat16, x_buffer_count=None,
                             force_k_tiling=False):
    """y = relu(x @ w1 + b1) @ w2 + b2 in a single fused Pallas kernel.

    x:  [B, D_IN]
    w1: [D_IN, HIDDEN]  (PyTorch Linear weight transposed), b1: [HIDDEN] or [1, HIDDEN]
    w2: [HIDDEN, D_OUT],                                    b2: [D_OUT] or [1, D_OUT]

    Wrap calls in jax.jit so the (no-op for aligned shapes) parameter pads are
    hoisted out of the steady state.
    """
    B, d_in = x.shape
    hidden = w1.shape[1]
    d_out = w2.shape[1]
    out_dtype = x.dtype
    itemsize = jnp.dtype(compute_dtype).itemsize
    row_align = 16 if itemsize == 2 else 8       # bf16 packs 2 rows / sublane

    # Lane-dense padding targets: every feature dim a multiple of 128 so matmul
    # operands fill full vregs and the output is stored with unmasked vst.
    d_in_p = _round_up(d_in, _LANE)
    hidden_p = _round_up(hidden, _LANE)
    d_out_p = _round_up(d_out, _LANE)

    # Parameter pad/cast (no-op when already lane-dense & compute_dtype; hoisted
    # under jit when params are constants).  Zero padding is inert through
    # matmul / bias / ReLU and padded output columns are sliced off below.
    w1_p = _pad2d(w1, d_in_p, hidden_p, compute_dtype)
    w2_p = _pad2d(w2, hidden_p, d_out_p, compute_dtype)
    b1_p = _pad2d(jnp.asarray(b1).reshape(1, -1), 1, hidden_p, jnp.float32)
    b2_p = _pad2d(jnp.asarray(b2).reshape(1, -1), 1, d_out_p, jnp.float32)

    vmem_cap, num_tc = _tpu_params()
    budget = (vmem_cap * 3) // 4                 # ~96 MiB v5e/v6e, ~48 MiB v7x

    flops = 2 * B * (d_in_p * hidden_p + hidden_p * d_out_p)
    bytes_accessed = (B * d_in_p * itemsize
                      + (w1_p.size + w2_p.size) * itemsize
                      + (b1_p.size + b2_p.size) * 4
                      + B * d_out_p * jnp.dtype(out_dtype).itemsize)
    cost = pl.CostEstimate(flops=flops, transcendentals=0,
                           bytes_accessed=bytes_accessed)

    def run(weight_bufs):
        single_buffer = (weight_bufs == 1)
        bt, k_tile = _choose_tiles(B, d_in_p, hidden_p, d_out_p, itemsize, budget,
                                   num_tc, row_align, weight_bufs, force_k_tiling,
                                   bt_override=batch_tile)
        b_pad = _round_up(B, bt)

        # Skip the activation pad when it would be a pure copy (aligned shapes).
        if b_pad == B and d_in_p == d_in:
            x_p = x.astype(compute_dtype)
        else:
            x_p = jnp.zeros((b_pad, d_in_p), compute_dtype).at[:B, :d_in].set(
                x.astype(compute_dtype))

        res = (dict(pipeline_mode=pl.Buffered(1))
               if (single_buffer and _HAS_BUFFERED) else {})
        xb = (dict(pipeline_mode=pl.Buffered(int(x_buffer_count)))
              if (x_buffer_count and _HAS_BUFFERED) else {})

        if k_tile is None:
            # Fully-resident weights, grid over batch only.
            est = _vmem_flat(bt, d_in_p, hidden_p, d_out_p, weight_bufs, itemsize)
            grid = (b_pad // bt,)
            in_specs = [
                pl.BlockSpec((bt, d_in_p), lambda i: (i, 0), **xb),          # x tile
                pl.BlockSpec((d_in_p, hidden_p), lambda i: (0, 0), **res),   # W1
                pl.BlockSpec((1, hidden_p), lambda i: (0, 0), **res),        # b1
                pl.BlockSpec((hidden_p, d_out_p), lambda i: (0, 0), **res),  # W2
                pl.BlockSpec((1, d_out_p), lambda i: (0, 0), **res),         # b2
            ]
            out_specs = pl.BlockSpec((bt, d_out_p), lambda i: (i, 0))
            scratch = []
            dims = ("parallel",)
            kernel = _mlp_kernel
        else:
            # K-tiled: stream W1 along D_IN with an f32 accumulator scratch.
            est = _vmem_ktiled(bt, k_tile, hidden_p, d_out_p, weight_bufs, itemsize)
            grid = (b_pad // bt, d_in_p // k_tile)
            in_specs = [
                pl.BlockSpec((bt, k_tile), lambda i, k: (i, k), **xb),          # x
                pl.BlockSpec((k_tile, hidden_p), lambda i, k: (k, 0)),          # W1 (streamed)
                pl.BlockSpec((1, hidden_p), lambda i, k: (0, 0), **res),        # b1
                pl.BlockSpec((hidden_p, d_out_p), lambda i, k: (0, 0), **res),  # W2
                pl.BlockSpec((1, d_out_p), lambda i, k: (0, 0), **res),         # b2
            ]
            out_specs = pl.BlockSpec((bt, d_out_p), lambda i, k: (i, 0))
            scratch = [pltpu.VMEM((bt, hidden_p), jnp.float32)]
            dims = ("parallel", "arbitrary")
            kernel = _mlp_kernel_ktiled

        vmem_limit = int(min(max(est + (8 << 20), 32 << 20), vmem_cap - (4 << 20)))

        y_pad = pl.pallas_call(
            kernel,
            out_shape=jax.ShapeDtypeStruct((b_pad, d_out_p), out_dtype),
            grid_spec=pltpu.PrefetchScalarGridSpec(
                num_scalar_prefetch=0,
                grid=grid,
                in_specs=in_specs,
                out_specs=out_specs,
                scratch_shapes=scratch,
            ),
            compiler_params=pltpu.CompilerParams(
                dimension_semantics=dims,
                vmem_limit_bytes=vmem_limit,
            ),
            cost_estimate=cost,
        )(x_p, w1_p, b1_p, w2_p, b2_p)
        return y_pad[:B, :d_out]

    if _HAS_BUFFERED:
        try:
            return run(weight_bufs=1)
        except pltpu.LoweringException:
            # Buffered(1) residency not lowerable on this toolchain: rebuild with
            # default double buffering (budgeted with weight_bufs=2).
            pass
    return run(weight_bufs=2)


def _reference(x, w1, b1, w2, b2, compute_dtype=jnp.bfloat16):
    """Pure-JAX reference using the same operand precision as the kernel."""
    cd = compute_dtype
    b1 = jnp.asarray(b1).reshape(1, -1).astype(jnp.float32)
    b2 = jnp.asarray(b2).reshape(1, -1).astype(jnp.float32)
    h = jnp.dot(x.astype(cd), w1.astype(cd), preferred_element_type=jnp.float32)
    h = jnp.maximum(h + b1, 0.0)
    y = jnp.dot(h.astype(cd), w2.astype(cd), preferred_element_type=jnp.float32)
    return (y + b2).astype(x.dtype)


if __name__ == "__main__":
    key = jax.random.PRNGKey(0)

    # ---- Test 1: fully-resident-weight path (default) ----
    B, D_IN, HIDDEN, D_OUT = 16, 32, 64, 16
    kx, kw1, kb1, kw2, kb2, key = jax.random.split(key, 6)
    x = jax.random.normal(kx, (B, D_IN), dtype=jnp.float32)
    # PyTorch Linear stores weight as [out, in]; we store the transpose [in, out].
    w1 = jax.random.normal(kw1, (D_IN, HIDDEN), dtype=jnp.float32) / jnp.sqrt(D_IN)
    b1 = jax.random.normal(kb1, (1, HIDDEN), dtype=jnp.float32) * 0.01
    w2 = jax.random.normal(kw2, (HIDDEN, D_OUT), dtype=jnp.float32) / jnp.sqrt(HIDDEN)
    b2 = jax.random.normal(kb2, (1, D_OUT), dtype=jnp.float32) * 0.01

    y = jax.block_until_ready(encoder_with_extra_layer(x, w1, b1, w2, b2))
    y_ref = _reference(x, w1, b1, w2, b2)
    assert y.shape == (B, D_OUT)
    assert jnp.allclose(y, y_ref, atol=2e-2, rtol=2e-2), "mismatch vs reference (flat path)"

    # ---- Test 2: K-tiled path (forced, to exercise the accumulator variant) ----
    B2, D_IN2, HIDDEN2, D_OUT2 = 24, 300, 48, 40
    kx2, kw12, kb12, kw22, kb22, key = jax.random.split(key, 6)
    x2 = jax.random.normal(kx2, (B2, D_IN2), dtype=jnp.float32)
    w12 = jax.random.normal(kw12, (D_IN2, HIDDEN2), dtype=jnp.float32) / jnp.sqrt(D_IN2)
    b12 = jax.random.normal(kb12, (1, HIDDEN2), dtype=jnp.float32) * 0.01
    w22 = jax.random.normal(kw22, (HIDDEN2, D_OUT2), dtype=jnp.float32) / jnp.sqrt(HIDDEN2)
    b22 = jax.random.normal(kb22, (1, D_OUT2), dtype=jnp.float32) * 0.01

    y2 = jax.block_until_ready(
        encoder_with_extra_layer(x2, w12, b12, w22, b22, force_k_tiling=True))
    y2_ref = _reference(x2, w12, b12, w22, b22)
    assert y2.shape == (B2, D_OUT2)
    assert jnp.allclose(y2, y2_ref, atol=2e-2, rtol=2e-2), "mismatch vs reference (K-tiled path)"

    print("KERNEL_OK")
</pallas_src>

<mosaic_0001>
module attributes {stable_mosaic.version = 11 : i64} {
  func.func @_mlp_kernel(%arg0: i32, %arg1: memref<16x128xbf16, #tpu.memory_space<vmem>>, %arg2: memref<128x128xbf16, #tpu.memory_space<vmem>>, %arg3: memref<1x128xf32, #tpu.memory_space<vmem>>, %arg4: memref<128x128xbf16, #tpu.memory_space<vmem>>, %arg5: memref<1x128xf32, #tpu.memory_space<vmem>>, %arg6: memref<16x128xf32, #tpu.memory_space<vmem>>) attributes {dimension_semantics = [#tpu.dimension_semantics<parallel>], iteration_bounds = array<i64: 1>, scalar_prefetch = 0 : i64, scratch_operands = 0 : i64, tpu.core_type = #tpu.core_type<tc>, window_params = [{transform_indices = @transform_0, window_bounds = array<i64: 16, 128>}, {pipeline_mode = #tpu.pipeline_mode<synchronous>, transform_indices = @transform_1, window_bounds = array<i64: 128, 128>}, {pipeline_mode = #tpu.pipeline_mode<synchronous>, transform_indices = @transform_2, window_bounds = array<i64: 1, 128>}, {pipeline_mode = #tpu.pipeline_mode<synchronous>, transform_indices = @transform_3, window_bounds = array<i64: 128, 128>}, {pipeline_mode = #tpu.pipeline_mode<synchronous>, transform_indices = @transform_4, window_bounds = array<i64: 1, 128>}, {transform_indices = @transform_5, window_bounds = array<i64: 16, 128>}]} {
    %c0 = arith.constant 0 : index
    %c0_0 = arith.constant 0 : index
    %0 = vector.load %arg1[%c0, %c0_0] : memref<16x128xbf16, #tpu.memory_space<vmem>>, vector<16x128xbf16>
    %c0_1 = arith.constant 0 : index
    %c0_2 = arith.constant 0 : index
    %1 = vector.load %arg2[%c0_1, %c0_2] : memref<128x128xbf16, #tpu.memory_space<vmem>>, vector<128x128xbf16>
    %cst = arith.constant dense<0.000000e+00> : vector<16x128xf32>
    %2 = tpu.matmul %0, %1, %cst {dimension_numbers = #tpu.dot_dimension_numbers<[1], [0], [0], [1], [0, 0, 1, 1], [], []>} : vector<16x128xbf16>, vector<128x128xbf16>, vector<16x128xf32> -> vector<16x128xf32>
    %c0_3 = arith.constant 0 : index
    %c0_4 = arith.constant 0 : index
    %3 = vector.load %arg3[%c0_3, %c0_4] : memref<1x128xf32, #tpu.memory_space<vmem>>, vector<1x128xf32>
    %4 = vector.broadcast %3 : vector<1x128xf32> to vector<16x128xf32>
    %5 = arith.addf %2, %4 : vector<16x128xf32>
    %cst_5 = arith.constant 0.000000e+00 : f32
    %6 = vector.broadcast %cst_5 : f32 to vector<16x128xf32>
    %7 = arith.maximumf %5, %6 : vector<16x128xf32>
    %8 = arith.truncf %7 : vector<16x128xf32> to vector<16x128xbf16>
    %c0_6 = arith.constant 0 : index
    %c0_7 = arith.constant 0 : index
    %9 = vector.load %arg4[%c0_6, %c0_7] : memref<128x128xbf16, #tpu.memory_space<vmem>>, vector<128x128xbf16>
    %cst_8 = arith.constant dense<0.000000e+00> : vector<16x128xf32>
    %10 = tpu.matmul %8, %9, %cst_8 {dimension_numbers = #tpu.dot_dimension_numbers<[1], [0], [0], [1], [0, 0, 1, 1], [], []>} : vector<16x128xbf16>, vector<128x128xbf16>, vector<16x128xf32> -> vector<16x128xf32>
    %c0_9 = arith.constant 0 : index
    %c0_10 = arith.constant 0 : index
    %11 = vector.load %arg5[%c0_9, %c0_10] : memref<1x128xf32, #tpu.memory_space<vmem>>, vector<1x128xf32>
    %12 = vector.broadcast %11 : vector<1x128xf32> to vector<16x128xf32>
    %13 = arith.addf %10, %12 : vector<16x128xf32>
    %c0_11 = arith.constant 0 : index
    %c0_12 = arith.constant 0 : index
    %14 = vector.load %arg6[%c0_11, %c0_12] : memref<16x128xf32, #tpu.memory_space<vmem>>, vector<16x128xf32>
    tpu.vector_store %arg6[%c0_11, %c0_12], %13 {strides = array<i32>} : memref<16x128xf32, #tpu.memory_space<vmem>>, vector<16x128xf32>,
    return
  }
  func.func @transform_0(%arg0: i32) -> (i32, i32) {
    %c0_i32 = arith.constant 0 : i32
    %c0_i32_0 = arith.constant 0 : i32
    return %arg0, %c0_i32 : i32, i32
  }
  func.func @transform_1(%arg0: i32) -> (i32, i32) {
    %c0_i32 = arith.constant 0 : i32
    %c0_i32_0 = arith.constant 0 : i32
    %c0_i32_1 = arith.constant 0 : i32
    return %c0_i32, %c0_i32_0 : i32, i32
  }
  func.func @transform_2(%arg0: i32) -> (i32, i32) {
    %c0_i32 = arith.constant 0 : i32
    %c0_i32_0 = arith.constant 0 : i32
    %c0_i32_1 = arith.constant 0 : i32
    return %c0_i32, %c0_i32_0 : i32, i32
  }
  func.func @transform_3(%arg0: i32) -> (i32, i32) {
    %c0_i32 = arith.constant 0 : i32
    %c0_i32_0 = arith.constant 0 : i32
    %c0_i32_1 = arith.constant 0 : i32
    return %c0_i32, %c0_i32_0 : i32, i32
  }
  func.func @transform_4(%arg0: i32) -> (i32, i32) {
    %c0_i32 = arith.constant 0 : i32
    %c0_i32_0 = arith.constant 0 : i32
    %c0_i32_1 = arith.constant 0 : i32
    return %c0_i32, %c0_i32_0 : i32, i32
  }
  func.func @transform_5(%arg0: i32) -> (i32, i32) {
    %c0_i32 = arith.constant 0 : i32
    %c0_i32_0 = arith.constant 0 : i32
    return %arg0, %c0_i32 : i32, i32
  }
}

</mosaic_0001>

<bundles_post_ra>
// kernel: tpu_custom_call.1
= control target key start
LH: loop header
LB: loop body
LE: loop exit
PB: predicated region body
PF: predicated region fallthrough
CT: control target
= control target key end

     0   :  { %10 = vsyncpa [#allocation3], 0  ;;  %s626_s0 = inlined_call_operand.hbm [shape: bf16[16,128], index: 0, kind: input, shape index: {}]   ;;  %s627_s1 = inlined_call_operand.hbm [shape: bf16[128,128], index: 1, kind: input, shape index: {}]   ;;  %s628_s2 = inlined_call_operand.vmem [shape: f32[1,128], index: 2, kind: input, shape index: {}]   ;;  %s629_s3 = inlined_call_operand.hbm [shape: bf16[128,128], index: 3, kind: input, shape index: {}]   ;;  %s630_s4 = inlined_call_operand.vmem [shape: f32[1,128], index: 4, kind: input, shape index: {}]   ;;  %s631_s5 = inlined_call_operand.hbm [shape: f32[16,128], index: 5, kind: output, shape index: {}]  }
   0x1   :  { %11 = vsyncpa [#allocation6], 0 }
   0x2   :  { %12 = vsyncpa [#allocation4], 0  ;;  %s516_s18 = smov [#allocation5]   ;;  %s517_s20 = smov [#allocation2]  }
   0x3   :  { %s30_s19 = sshll.u32 %s516_s18, 4  ;;  %s18_s21 = sshll.u32 %s517_s20, 4  ;;  %s31_s19 = int_to_ptr.vmem [resolvable:$true] %s30_s19  ;;  %s556_s21 = int_to_ptr.vmem [resolvable:$true] %s18_s21 }
   0x4   :  { %s422_s24 = scalar_lea.hbm %s627_s1, 1024 }
   0x5   :  { %p423_p0 = scmp.ne.s32.totalorder %s627_s1, %s422_s24  ;;  %p426_p1 = scmp.lt.u32.totalorder %s422_s24, %s627_s1 }
   0x7   :  { %p428_p2 = pnand %p426_p1, %p423_p0 }
   0x9   :  { %431 = shalt.err (!%p428_p2)
}
   0xa   :  { %s432_s29 = scalar_lea.vmem %s31_s19, 1024  ;;  %p437_p4 = scmp.lt.s32.totalorder %s31_s19, %s31_s19 }
   0xb   :  { %p433_p3 = scmp.ne.s32.totalorder %s31_s19, %s432_s29  ;;  %p438_p5 = scmp.lt.s32.totalorder %s432_s29, %s432_s29 }
   0xd   :  { %p439_p6 = por %p438_p5, %p437_p4 }
   0xf   :  { %p440_p7 = pnand %p439_p6, %p433_p3 }
  0x11   :  { %443 = shalt.err (!%p440_p7)
}
  0x12   :  { %s518_s30 = smov 64   ;;  %s519_s6 = smov 4  }
  0x13   :  { %36 = dma.hbm_to_vmem [thread:$0]  %s627_s1, 1024, %s31_s19, [#allocation6], %s518_s30, %s518_s30, %s519_s6  }
  0x14   :  { %s444_s11 = scalar_lea.hbm %s626_s0, 128 }
  0x15   :  { %p445_p8 = scmp.ne.s32.totalorder %s626_s0, %s444_s11  ;;  %p448_p9 = scmp.lt.u32.totalorder %s444_s11, %s626_s0 }
  0x17   :  { %p450_p10 = pnand %p448_p9, %p445_p8 }
  0x19   :  { %453 = shalt.err (!%p450_p10)
}
  0x1a   :  { %s454_s16 = scalar_lea.vmem %s556_s21, 128  ;;  %p459_p12 = scmp.lt.s32.totalorder %s556_s21, %s556_s21 }
  0x1b   :  { %p455_p11 = scmp.ne.s32.totalorder %s556_s21, %s454_s16  ;;  %p460_p13 = scmp.lt.s32.totalorder %s454_s16, %s454_s16 }
  0x1d   :  { %p461_p0 = por %p460_p13, %p459_p12 }
  0x1f   :  { %p462_p1 = pnand %p461_p0, %p455_p11 }
  0x21   :  { %465 = shalt.err (!%p462_p1)
}
  0x22   :  { %24 = dma.hbm_to_vmem [thread:$0]  %s626_s0, 128, %s556_s21, [#allocation3], %s518_s30, %s518_s30, %s519_s6  }
  0x23   :  { %s520_s18 = smov [#allocation7]   ;;  %s466_s23 = scalar_lea.hbm %s629_s3, 1024 }
  0x24   :  { %s44_s19 = sshll.u32 %s520_s18, 4  ;;  %p467_p2 = scmp.ne.s32.totalorder %s629_s3, %s466_s23  ;;  %s45_s19 = int_to_ptr.vmem [resolvable:$true] %s44_s19 }
  0x25   :  { %p470_p3 = scmp.lt.u32.totalorder %s466_s23, %s629_s3 }
  0x27   :  { %p472_p4 = pnand %p470_p3, %p467_p2 }
  0x29   :  { %475 = shalt.err (!%p472_p4)
}
  0x2a   :  { %s476_s28 = scalar_lea.vmem %s45_s19, 1024  ;;  %p481_p6 = scmp.lt.s32.totalorder %s45_s19, %s45_s19 }
  0x2b   :  { %p477_p5 = scmp.ne.s32.totalorder %s45_s19, %s476_s28  ;;  %p482_p7 = scmp.lt.s32.totalorder %s476_s28, %s476_s28 }
  0x2d   :  { %p483_p8 = por %p482_p7, %p481_p6 }
  0x2f   :  { %p484_p9 = pnand %p483_p8, %p477_p5 }
  0x31   :  { %487 = shalt.err (!%p484_p9)
}
  0x32   :  { %50 = dma.hbm_to_vmem [thread:$0]  %s629_s3, 1024, %s45_s19, [#allocation6], %s518_s30, %s518_s30, %s519_s6  }
  0x33   :  { %510 = dma.done.wait [#allocation3], 128  }
  0x34   :  { %511 = vsyncadd [#allocation3], 4294967168 }
  0x35   :  { %512 = dma.done.wait [#allocation6], 2048  }
  0x36   :  { %513 = vsyncadd [#allocation6], 4294965248  ;;  %v521_v0 = vmov 0.0   ;;  %vm522_vm0 = vmmov 0   ;;  %v405_v1 = vld [vmem:[#allocation5] sm:$0xff]   ;;  %v406_v2 = vld [vmem:[#allocation5 + $0x8] sm:$0xff]  }
  0x37   :  { %355 = vmatprep.subr.bf16.mxu0 %v521_v0  ;;  %371 = vmatprep.mubr.msk.bf16.mxu0 %vm522_vm0, %v521_v0  ;;  %v407_v3 = vld [vmem:[#allocation5 + $0x10] sm:$0xff]   ;;  %v414_v4 = vld [vmem:[#allocation7] sm:$0xff]   ;;  %v408_v5 = vld [vmem:[#allocation5 + $0x18] sm:$0xff]   ;;  %s523_s7 = smov [#allocation8]  }
  0x38   :  { %375 = vmatprep.subr.bf16.mxu1 %v521_v0  ;;  %391 = vmatprep.mubr.msk.bf16.mxu1 %vm522_vm0, %v521_v0  ;;  %v415_v6 = vld [vmem:[#allocation7 + $0x8] sm:$0xff]   ;;  %v409_v7 = vld [vmem:[#allocation5 + $0x20] sm:$0xff]   ;;  %v416_v8 = vld [vmem:[#allocation7 + $0x10] sm:$0xff]   ;;  %s305_s8 = sshll.u32 %s523_s7, 4  ;;  %s306_s8 = int_to_ptr.vmem [resolvable:$true] %s305_s8 }
  0x39   :  { %356 = vmatpush3.bf16.msra.mxu0 %v405_v1  ;;  %376 = vmatpush3.bf16.msra.mxu1 %v414_v4  ;;  %v410_v9 = vld [vmem:[#allocation5 + $0x28] sm:$0xff]   ;;  %v417_v10 = vld [vmem:[#allocation7 + $0x18] sm:$0xff]   ;;  %v411_v11 = vld [vmem:[#allocation5 + $0x30] sm:$0xff]   ;;  %p493_p11 = scmp.lt.s32.totalorder %s306_s8, %s306_s8 }
  0x3a   :  { %357 = vmatprep.subr.bf16.mxu0 %v521_v0  ;;  %377 = vmatprep.subr.bf16.mxu1 %v521_v0  ;;  %v418_v12 = vld [vmem:[#allocation7 + $0x20] sm:$0xff]   ;;  %v412_v13 = vld [vmem:[#allocation5 + $0x38] sm:$0xff]   ;;  %v419_v14 = vld [vmem:[#allocation7 + $0x28] sm:$0xff]  }
  0x3b   :  { %v413_v15 = vld [vmem:[#allocation2] sm:$0xff]   ;;  %v420_v16 = vld [vmem:[#allocation7 + $0x30] sm:$0xff]  }
  0x3c   :  { %v421_v17 = vld [vmem:[#allocation7 + $0x38] sm:$0xff]  }
  0x3d   :  { %358 = vmatpush3.bf16.msra.mxu0 %v406_v2  ;;  %378 = vmatpush3.bf16.msra.mxu1 %v415_v6  ;;  %v318_v18 = vld [vmem:[%s628_s2] ss:$0 sm:$0xff]  ;;  %s488_s2 = scalar_lea.vmem %s306_s8, 256 }
  0x3e   :  { %359 = vmatprep.subr.bf16.mxu0 %v521_v0  ;;  %379 = vmatprep.subr.bf16.mxu1 %v521_v0  ;;  %v328_v28 = vld [vmem:[%s630_s4] ss:$0 sm:$0xff]  ;;  %p489_p10 = scmp.ne.s32.totalorder %s306_s8, %s488_s2  ;;  %p494_p12 = scmp.lt.s32.totalorder %s488_s2, %s488_s2 }
  0x40   :  { %p495_p13 = por %p494_p12, %p493_p11 }
  0x41   :  { %360 = vmatpush3.bf16.msra.mxu0 %v407_v3  ;;  %380 = vmatpush3.bf16.msra.mxu1 %v416_v8 }
  0x42   :  { %361 = vmatprep.subr.bf16.mxu0 %v521_v0  ;;  %381 = vmatprep.subr.bf16.mxu1 %v521_v0  ;;  %p496_p0 = pnand %p495_p13, %p489_p10 }
  0x45   :  { %362 = vmatpush3.bf16.msra.mxu0 %v408_v5  ;;  %382 = vmatpush3.bf16.msra.mxu1 %v417_v10 }
  0x46   :  { %363 = vmatprep.subr.bf16.mxu0 %v521_v0  ;;  %383 = vmatprep.subr.bf16.mxu1 %v521_v0 }
  0x49   :  { %364 = vmatpush3.bf16.msra.mxu0 %v409_v7  ;;  %384 = vmatpush3.bf16.msra.mxu1 %v418_v12 }
  0x4a   :  { %365 = vmatprep.subr.bf16.mxu0 %v521_v0  ;;  %385 = vmatprep.subr.bf16.mxu1 %v521_v0 }
  0x4d   :  { %366 = vmatpush3.bf16.msra.mxu0 %v410_v9  ;;  %386 = vmatpush3.bf16.msra.mxu1 %v419_v14 }
  0x4e   :  { %367 = vmatprep.subr.bf16.mxu0 %v521_v0  ;;  %387 = vmatprep.subr.bf16.mxu1 %v521_v0 }
  0x51   :  { %368 = vmatpush3.bf16.msra.mxu0 %v411_v11  ;;  %388 = vmatpush3.bf16.msra.mxu1 %v420_v16 }
  0x52   :  { %369 = vmatprep.subr.bf16.mxu0 %v521_v0  ;;  %389 = vmatprep.subr.bf16.mxu1 %v521_v0 }
  0x55   :  { %370 = vmatpush3.bf16.msra.mxu0 %v412_v13  ;;  %390 = vmatpush3.bf16.msra.mxu1 %v421_v17 }
  0x58   :  { %372 = vmatmul.mubr.bf16.vlgmr.msra.gmra.mrb[0].mxu0 %v413_v15 }
 0x12b   :  { %v176_v19 = vpop.f32.mrb[0].mxu0 }
 0x12c   :  { %v177_v20 = vadd.f32 %v318_v18, %v176_v19  ;;  %v373_v21 = vpop.f32.mrb[1].mxu0 }
 0x12d   :  { %v179_v22 = vpop.f32.mrb[2].mxu0 }
 0x12e   :  { %v180_v23 = vadd.f32 %v318_v18, %v179_v22  ;;  %v374_v24 = vpop.f32.mrb[3].mxu0  ;;  %v183_v25 = vmax.f32 %v177_v20, 0.0 }
 0x130   :  { %v184_v26 = vmax.f32 %v180_v23, 0.0 }
 0x132   :  { %v185_v27 = vpack.c.bf16 %v184_v26, %v183_v25 }
 0x134   :  { %392 = vmatmul.mubr.bf16.vlgmr.msra.gmra.mrb[0].mxu1 %v185_v27 }
 0x207   :  { %v291_v29 = vpop.f32.mrb[0].mxu1 }
 0x208   :  { %v292_v30 = vadd.f32 %v328_v28, %v291_v29  ;;  %v393_v31 = vpop.f32.mrb[1].mxu1 }
 0x209   :  { %v294_v32 = vpop.f32.mrb[2].mxu1 }
 0x20a   :  { %298 = vst [vmem:[#allocation8] sm:$0xff] %v292_v30  ;;  %v295_v33 = vadd.f32 %v328_v28, %v294_v32  ;;  %v394_v34 = vpop.f32.mrb[3].mxu1 }
 0x20c   :  { %299 = vst [vmem:[#allocation8 + $0x8] sm:$0xff] %v295_v33 }
 0x20d   :  { %499 = shalt.err (!%p496_p0)
}
 0x20e   :  { %s500_s10 = scalar_lea.hbm %s631_s5, 256 }
 0x20f   :  { %p501_p1 = scmp.ne.s32.totalorder %s631_s5, %s500_s10  ;;  %p504_p2 = scmp.lt.u32.totalorder %s500_s10, %s631_s5 }
 0x211   :  { %p506_p3 = pnand %p504_p2, %p501_p1 }
 0x213   :  { %509 = shalt.err (!%p506_p3)
}
 0x214   :  { %s524_s15 = smov 128   ;;  %s525_s16 = smov 8  }
 0x215   :  { %311 = dma.vmem_to_hbm [thread:$0]  %s306_s8, 256, %s631_s5, [#allocation4], %s524_s15, %s524_s15, %s525_s16  }
 0x216   :  { %514 = dma.done.wait [#allocation4], 256  }
 0x217   :  { %515 = vsyncadd [#allocation4], 4294967040 }
 0x218   :  { %315 = vsyncpa [#allocation3], 1 }
 0x219   :  { %316 = vsyncpa [#allocation6], 1 }
 0x21a   :  { %317 = vsyncpa [#allocation4], 1 }

</bundles_post_ra>
